<compile_context>
chip_gen: v5e
topology: v5e:2x2
jax: 0.10.0
libtpu: 0.0.40
codegen_flags: <defaults>
</compile_context>

<pallas_src>
import jax
import jax.numpy as jnp
from jax import lax
from jax.experimental import pallas as pl
from jax.experimental.pallas import tpu as pltpu

IN_DIM = 512
HID_DIM = 256
NUM_CLASSES = 8
MAX_BATCH_TILE = 2048      # rows per grid step; ~9 MiB double-buffered VMEM worst case
_MULTI_TILE_ALIGN = 256    # multi-tile batch tiles are multiples of this (lane-aligned)


def _round_up(x, m):
    return ((x + m - 1) // m) * m


def _choose_batch_tile(b8):
    """b8: batch rounded up to a multiple of 8. Returns the per-step tile size."""
    if b8 <= _MULTI_TILE_ALIGN:
        # Single tile; block == (padded) array, so no alignment constraint issues.
        return b8
    # >= 2 grid steps so both v7x TensorCores get work; multiple of 256 keeps every
    # block (including the transposed logits tile) lane-aligned.
    return min(MAX_BATCH_TILE, _round_up(pl.cdiv(b8, 2), _MULTI_TILE_ALIGN))


def _mlp_kernel(x_ref, w1_ref, b1_ref, w2_ref, b2_ref, o_ref):
    # x_ref : (TB, 512) f32        w1_ref: (512, 256) bf16    b1_ref: (1, 256) f32
    # w2_ref: (C_sub, 256) bf16    b2_ref: (C_sub, 1) f32     o_ref : (C_sub, TB) f32
    #
    # Cast x to bf16 in-kernel (VPU work hidden under the MXU; avoids a separate
    # wrapper-side cast pass over x in HBM).
    x = x_ref[...].astype(w1_ref.dtype)

    # Linear(512, 256) + bias + ReLU   (bf16 MXU matmul, f32 accumulate, f32 VPU epilogue)
    h = jnp.dot(x, w1_ref[...], preferred_element_type=jnp.float32)      # (TB, 256)
    h = jnp.maximum(h + b1_ref[...], 0.0)

    # Dropout(p=0.4) is identity in eval mode.
    # TODO(synk): training-mode dropout would need pltpu.prng_seed + prng_random_bits.

    # Linear(256, num_classes), transposed output form:
    #   (C_sub, 256) x (TB, 256)^T -> (C_sub, TB)   (lane dim = batch tile, no padding cols)
    out = lax.dot_general(
        w2_ref[...], h.astype(w2_ref.dtype),
        dimension_numbers=(((1,), (1,)), ((), ())),
        preferred_element_type=jnp.float32)
    o_ref[...] = (out + b2_ref[...]).astype(o_ref.dtype)


def prepare_params(w1, b1, w2, b2, compute_dtype=jnp.bfloat16):
    """One-time parameter prep (hoisted out of the per-call hot path).

    w1: (256, 512), b1: (256,), w2: (C, 256), b2: (C,)  -- PyTorch nn.Linear layout.
    Returns transposed / sublane-padded / dtype-cast params for the kernel.
    """
    num_classes = w2.shape[0]
    c_sub = _round_up(num_classes, 8)                               # pad classes to sublane mult.

    w1_t = jnp.transpose(w1).astype(compute_dtype)                  # (512, 256)
    b1_r = b1.reshape(1, HID_DIM).astype(jnp.float32)               # (1, 256)

    w2_p = jnp.zeros((c_sub, HID_DIM), dtype=compute_dtype)         # (C_sub, 256), natural layout
    w2_p = w2_p.at[:num_classes, :].set(w2.astype(compute_dtype))
    b2_p = jnp.zeros((c_sub, 1), dtype=jnp.float32)                 # (C_sub, 1)
    b2_p = b2_p.at[:num_classes, 0].set(b2.astype(jnp.float32))

    return (w1_t, b1_r, w2_p, b2_p, num_classes)


def iemo_classifier_forward(x, params):
    """x: (B, 512) float array. params: output of prepare_params().
    Returns (B, num_classes) float32 logits."""
    w1_t, b1_r, w2_p, b2_p, num_classes = params
    B = x.shape[0]
    c_sub = w2_p.shape[0]

    if x.dtype != jnp.float32:
        x = x.astype(jnp.float32)

    # Round batch up to a sublane multiple; pads only in the rare B % 8 != 0 case.
    b8 = _round_up(B, 8)
    x_in = x if b8 == B else jnp.pad(x, ((0, b8 - B), (0, 0)))

    tb = _choose_batch_tile(b8)
    num_tiles = pl.cdiv(b8, tb)
    b_pad = num_tiles * tb       # output lane extent; last x block may read past b8 (garbage
                                 # rows affect only their own columns and are sliced off below)

    bf16_bytes = jnp.dtype(w1_t.dtype).itemsize
    flops = 2 * b_pad * (IN_DIM * HID_DIM + HID_DIM * c_sub)
    bytes_accessed = (
        b8 * IN_DIM * 4                                  # x (f32, read once)
        + IN_DIM * HID_DIM * bf16_bytes                  # w1
        + HID_DIM * 4                                    # b1
        + c_sub * HID_DIM * bf16_bytes                   # w2
        + c_sub * 4                                      # b2
        + c_sub * b_pad * 4                              # transposed logits writeback
    )

    out_t = pl.pallas_call(
        _mlp_kernel,
        out_shape=jax.ShapeDtypeStruct((c_sub, b_pad), jnp.float32),
        grid_spec=pltpu.PrefetchScalarGridSpec(
            num_scalar_prefetch=0,
            grid=(num_tiles,),
            in_specs=[
                pl.BlockSpec((tb, IN_DIM), lambda i: (i, 0)),        # x tile (f32)
                pl.BlockSpec((IN_DIM, HID_DIM), lambda i: (0, 0)),   # w1 (pinned)
                pl.BlockSpec((1, HID_DIM), lambda i: (0, 0)),        # b1 (pinned)
                pl.BlockSpec((c_sub, HID_DIM), lambda i: (0, 0)),    # w2 (pinned)
                pl.BlockSpec((c_sub, 1), lambda i: (0, 0)),          # b2 (pinned)
            ],
            out_specs=pl.BlockSpec((c_sub, tb), lambda i: (0, i)),   # transposed logits tile
        ),
        compiler_params=pltpu.CompilerParams(
            dimension_semantics=("parallel",),
            vmem_limit_bytes=32 * 1024 * 1024),
        cost_estimate=pl.CostEstimate(
            flops=flops, transcendentals=0, bytes_accessed=bytes_accessed),
    )(x_in, w1_t, b1_r, w2_p, b2_p)

    # Drop class padding rows / batch padding columns, return (B, num_classes).
    return out_t[:num_classes, :B].T


def init_params(key, num_classes=NUM_CLASSES):
    """Deterministic init matching the module: weights ~ N(0, 0.01), biases = 0."""
    k1, k2 = jax.random.split(key)
    w1 = 0.01 * jax.random.normal(k1, (HID_DIM, IN_DIM), dtype=jnp.float32)
    b1 = jnp.zeros((HID_DIM,), dtype=jnp.float32)
    w2 = 0.01 * jax.random.normal(k2, (num_classes, HID_DIM), dtype=jnp.float32)
    b2 = jnp.zeros((num_classes,), dtype=jnp.float32)
    return w1, b1, w2, b2


def _reference(x, w1, b1, w2, b2):
    h = jnp.maximum(x @ w1.T + b1, 0.0)
    return h @ w2.T + b2


if __name__ == "__main__":
    key = jax.random.PRNGKey(0)
    k_param, k_x1, k_x2, k_x3 = jax.random.split(key, 4)

    w1, b1, w2, b2 = init_params(k_param, NUM_CLASSES)
    params = prepare_params(w1, b1, w2, b2)

    # Case 1: small aligned batch (single tile).
    B1 = 8
    x1 = jax.random.normal(k_x1, (B1, IN_DIM), dtype=jnp.float32)
    out1 = jax.block_until_ready(iemo_classifier_forward(x1, params))
    ref1 = _reference(x1, w1, b1, w2, b2)
    assert out1.shape == (B1, NUM_CLASSES), out1.shape
    assert jnp.allclose(out1, ref1, atol=5e-3, rtol=5e-2), \
        float(jnp.max(jnp.abs(out1 - ref1)))

    # Case 2: batch not a multiple of 8 (exercises the small row-padding path).
    B2 = 37
    x2 = jax.random.normal(k_x2, (B2, IN_DIM), dtype=jnp.float32)
    out2 = jax.block_until_ready(iemo_classifier_forward(x2, params))
    ref2 = _reference(x2, w1, b1, w2, b2)
    assert out2.shape == (B2, NUM_CLASSES), out2.shape
    assert jnp.allclose(out2, ref2, atol=5e-3, rtol=5e-2), \
        float(jnp.max(jnp.abs(out2 - ref2)))

    # Case 3: multi-tile batch with a partial last tile (exercises >=2 parallel
    # grid steps and the masked boundary block).
    B3 = 600
    x3 = jax.random.normal(k_x3, (B3, IN_DIM), dtype=jnp.float32)
    out3 = jax.block_until_ready(iemo_classifier_forward(x3, params))
    ref3 = _reference(x3, w1, b1, w2, b2)
    assert out3.shape == (B3, NUM_CLASSES), out3.shape
    assert jnp.allclose(out3, ref3, atol=5e-3, rtol=5e-2), \
        float(jnp.max(jnp.abs(out3 - ref3)))

    print("KERNEL_OK")
</pallas_src>

<mosaic_0001>
module attributes {stable_mosaic.version = 11 : i64} {
  func.func @_mlp_kernel(%arg0: i32, %arg1: memref<8x512xf32, #tpu.memory_space<vmem>>, %arg2: memref<512x256xbf16, #tpu.memory_space<vmem>>, %arg3: memref<1x256xf32, #tpu.memory_space<vmem>>, %arg4: memref<8x256xbf16, #tpu.memory_space<vmem>>, %arg5: memref<8x1xf32, #tpu.memory_space<vmem>>, %arg6: memref<8x8xf32, #tpu.memory_space<vmem>>) attributes {dimension_semantics = [#tpu.dimension_semantics<parallel>], iteration_bounds = array<i64: 1>, scalar_prefetch = 0 : i64, scratch_operands = 0 : i64, tpu.core_type = #tpu.core_type<tc>, window_params = [{transform_indices = @transform_0, window_bounds = array<i64: 8, 512>}, {pipeline_mode = #tpu.pipeline_mode<synchronous>, transform_indices = @transform_1, window_bounds = array<i64: 512, 256>}, {pipeline_mode = #tpu.pipeline_mode<synchronous>, transform_indices = @transform_2, window_bounds = array<i64: 1, 256>}, {pipeline_mode = #tpu.pipeline_mode<synchronous>, transform_indices = @transform_3, window_bounds = array<i64: 8, 256>}, {pipeline_mode = #tpu.pipeline_mode<synchronous>, transform_indices = @transform_4, window_bounds = array<i64: 8, 1>}, {transform_indices = @transform_5, window_bounds = array<i64: 8, 8>}]} {
    %c0 = arith.constant 0 : index
    %c0_0 = arith.constant 0 : index
    %0 = vector.load %arg1[%c0, %c0_0] : memref<8x512xf32, #tpu.memory_space<vmem>>, vector<8x512xf32>
    %1 = arith.truncf %0 : vector<8x512xf32> to vector<8x512xbf16>
    %c0_1 = arith.constant 0 : index
    %c0_2 = arith.constant 0 : index
    %2 = vector.load %arg2[%c0_1, %c0_2] : memref<512x256xbf16, #tpu.memory_space<vmem>>, vector<512x256xbf16>
    %cst = arith.constant dense<0.000000e+00> : vector<8x256xf32>
    %3 = tpu.matmul %1, %2, %cst {dimension_numbers = #tpu.dot_dimension_numbers<[1], [0], [0], [1], [0, 0, 1, 1], [], []>} : vector<8x512xbf16>, vector<512x256xbf16>, vector<8x256xf32> -> vector<8x256xf32>
    %c0_3 = arith.constant 0 : index
    %c0_4 = arith.constant 0 : index
    %4 = vector.load %arg3[%c0_3, %c0_4] : memref<1x256xf32, #tpu.memory_space<vmem>>, vector<1x256xf32>
    %5 = vector.broadcast %4 : vector<1x256xf32> to vector<8x256xf32>
    %6 = arith.addf %3, %5 : vector<8x256xf32>
    %cst_5 = arith.constant 0.000000e+00 : f32
    %7 = vector.broadcast %cst_5 : f32 to vector<8x256xf32>
    %8 = arith.maximumf %6, %7 : vector<8x256xf32>
    %c0_6 = arith.constant 0 : index
    %c0_7 = arith.constant 0 : index
    %9 = vector.load %arg4[%c0_6, %c0_7] : memref<8x256xbf16, #tpu.memory_space<vmem>>, vector<8x256xbf16>
    %10 = arith.truncf %8 : vector<8x256xf32> to vector<8x256xbf16>
    %cst_8 = arith.constant dense<0.000000e+00> : vector<8x8xf32>
    %11 = tpu.matmul %9, %10, %cst_8 {dimension_numbers = #tpu.dot_dimension_numbers<[1], [1], [0], [0], [0, 0, 1, 0], [], []>} : vector<8x256xbf16>, vector<8x256xbf16>, vector<8x8xf32> -> vector<8x8xf32>
    %c0_9 = arith.constant 0 : index
    %c0_10 = arith.constant 0 : index
    %12 = vector.load %arg5[%c0_9, %c0_10] : memref<8x1xf32, #tpu.memory_space<vmem>>, vector<8x1xf32>
    %13 = vector.broadcast %12 : vector<8x1xf32> to vector<8x8xf32>
    %14 = arith.addf %11, %13 : vector<8x8xf32>
    %c0_11 = arith.constant 0 : index
    %c0_12 = arith.constant 0 : index
    %15 = vector.load %arg6[%c0_11, %c0_12] : memref<8x8xf32, #tpu.memory_space<vmem>>, vector<8x8xf32>
    tpu.vector_store %arg6[%c0_11, %c0_12], %14 {strides = array<i32>} : memref<8x8xf32, #tpu.memory_space<vmem>>, vector<8x8xf32>,
    return
  }
  func.func @transform_0(%arg0: i32) -> (i32, i32) {
    %c0_i32 = arith.constant 0 : i32
    %c0_i32_0 = arith.constant 0 : i32
    return %arg0, %c0_i32 : i32, i32
  }
  func.func @transform_1(%arg0: i32) -> (i32, i32) {
    %c0_i32 = arith.constant 0 : i32
    %c0_i32_0 = arith.constant 0 : i32
    %c0_i32_1 = arith.constant 0 : i32
    return %c0_i32, %c0_i32_0 : i32, i32
  }
  func.func @transform_2(%arg0: i32) -> (i32, i32) {
    %c0_i32 = arith.constant 0 : i32
    %c0_i32_0 = arith.constant 0 : i32
    %c0_i32_1 = arith.constant 0 : i32
    return %c0_i32, %c0_i32_0 : i32, i32
  }
  func.func @transform_3(%arg0: i32) -> (i32, i32) {
    %c0_i32 = arith.constant 0 : i32
    %c0_i32_0 = arith.constant 0 : i32
    %c0_i32_1 = arith.constant 0 : i32
    return %c0_i32, %c0_i32_0 : i32, i32
  }
  func.func @transform_4(%arg0: i32) -> (i32, i32) {
    %c0_i32 = arith.constant 0 : i32
    %c0_i32_0 = arith.constant 0 : i32
    %c0_i32_1 = arith.constant 0 : i32
    return %c0_i32, %c0_i32_0 : i32, i32
  }
  func.func @transform_5(%arg0: i32) -> (i32, i32) {
    %c0_i32 = arith.constant 0 : i32
    %c0_i32_0 = arith.constant 0 : i32
    return %c0_i32, %arg0 : i32, i32
  }
}

</mosaic_0001>

<bundles_post_ra>
// kernel: tpu_custom_call.1
= control target key start
LH: loop header
LB: loop body
LE: loop exit
PB: predicated region body
PF: predicated region fallthrough
CT: control target
= control target key end

     0   :  { %10 = vsyncpa [#allocation3], 0  ;;  %s1093_s0 = inlined_call_operand.hbm [shape: f32[8,512], index: 0, kind: input, shape index: {}]   ;;  %s1094_s1 = inlined_call_operand.hbm [shape: bf16[512,256], index: 1, kind: input, shape index: {}]   ;;  %s1095_s2 = inlined_call_operand.vmem [shape: f32[1,256], index: 2, kind: input, shape index: {}]   ;;  %s1096_s3 = inlined_call_operand.vmem [shape: bf16[8,256], index: 3, kind: input, shape index: {}]   ;;  %s1097_s4 = inlined_call_operand.vmem [shape: f32[8,1], index: 4, kind: input, shape index: {}]   ;;  %s1098_s5 = inlined_call_operand.hbm [shape: f32[8,8], index: 5, kind: output, shape index: {}]  }
   0x1   :  { %11 = vsyncpa [#allocation6], 0 }
   0x2   :  { %12 = vsyncpa [#allocation4], 0  ;;  %s18_s20 = sshll.u32 %s1093_s0, 4  ;;  %s1023_s21 = smov [#allocation2]   ;;  %s19_s20 = int_to_ptr.hbm [resolvable:$true] %s18_s20 }
   0x3   :  { %s20_s22 = sshll.u32 %s1023_s21, 4  ;;  %s28_s25 = sshll.u32 %s1094_s1, 4  ;;  %s21_s22 = int_to_ptr.vmem [resolvable:$true] %s20_s22  ;;  %s29_s25 = int_to_ptr.hbm [resolvable:$true] %s28_s25 }
   0x4   :  { %23 = dma.hbm_to_vmem [thread:$0]  %s19_s20, 512, %s21_s22, [#allocation3]  }
   0x5   :  { %s1024_s26 = smov [#allocation5]   ;;  %s1025_s28 = smov 128  }
   0x6   :  { %s30_s27 = sshll.u32 %s1024_s26, 4  ;;  %s1026_s29 = smov 8   ;;  %s31_s27 = int_to_ptr.vmem [resolvable:$true] %s30_s27 }
   0x7   :  { %36 = dma.hbm_to_vmem [thread:$0]  %s29_s25, 8192, %s31_s27, [#allocation6], %s1025_s28, %s1025_s28, %s1026_s29  }
   0x8   :  { %1017 = dma.done.wait [#allocation3], 512  }
   0x9   :  { %1018 = vsyncadd [#allocation3], 4294966784 }
   0xa   :  { %1019 = dma.done.wait [#allocation6], 8192  }
   0xb   :  { %1020 = vsyncadd [#allocation6], 4294959104  ;;  %v676_v0 = vld [vmem:[#allocation5 + $0x70] sm:$0xf]  ;;  %v889_v1 = vld [vmem:[#allocation5 + $0x74] sm:$0xf0] }
   0xc   :  { %v740_v2 = vld [vmem:[#allocation5 + $0xf0] sm:$0xf]  ;;  %v677_v3 = vor.u32 %v889_v1, %v676_v0  ;;  %v905_v4 = vld [vmem:[#allocation5 + $0xf4] sm:$0xf0]  ;;  %v668_v11 = vld [vmem:[#allocation5 + $0x60] sm:$0xf] }
   0xd   :  { %v804_v5 = vld [vmem:[#allocation5 + $0x170] sm:$0xf]  ;;  %v921_v6 = vld [vmem:[#allocation5 + $0x174] sm:$0xf0]  ;;  %v741_v7 = vor.u32 %v905_v4, %v740_v2  ;;  %v887_v13 = vld [vmem:[#allocation5 + $0x64] sm:$0xf0] }
   0xe   :  { %v805_v8 = vor.u32 %v921_v6, %v804_v5  ;;  %v868_v9 = vld [vmem:[#allocation5 + $0x1f0] sm:$0xf]  ;;  %v937_v10 = vld [vmem:[#allocation5 + $0x1f4] sm:$0xf0]  ;;  %450 = vmatpush.bf16.msra.mxu0 %v677_v3  ;;  %v732_v14 = vld [vmem:[#allocation5 + $0xe0] sm:$0xf]  ;;  %v669_v16 = vor.u32 %v887_v13, %v668_v11 }
   0xf   :  { %v869_v12 = vor.u32 %v937_v10, %v868_v9  ;;  %v903_v15 = vld [vmem:[#allocation5 + $0xe4] sm:$0xf0]  ;;  %463 = vmatpush.bf16.msra.mxu1 %v741_v7  ;;  %v796_v18 = vld [vmem:[#allocation5 + $0x160] sm:$0xf]  ;;  %v660_v23 = vld [vmem:[#allocation5 + $0x50] sm:$0xf] }
  0x10   :  { %476 = vmatpush.bf16.msra.mxu2 %v805_v8  ;;  %v733_v17 = vor.u32 %v903_v15, %v732_v14  ;;  %v919_v19 = vld [vmem:[#allocation5 + $0x164] sm:$0xf0]  ;;  %v860_v20 = vld [vmem:[#allocation5 + $0x1e0] sm:$0xf]  ;;  %v885_v24 = vld [vmem:[#allocation5 + $0x54] sm:$0xf0] }
  0x11   :  { %489 = vmatpush.bf16.msra.mxu3 %v869_v12  ;;  %v797_v21 = vor.u32 %v919_v19, %v796_v18  ;;  %v935_v22 = vld [vmem:[#allocation5 + $0x1e4] sm:$0xf0]  ;;  %v724_v26 = vld [vmem:[#allocation5 + $0xd0] sm:$0xf]  ;;  %v901_v27 = vld [vmem:[#allocation5 + $0xd4] sm:$0xf0]  ;;  %v661_v29 = vor.u32 %v885_v24, %v660_v23 }
  0x12   :  { %v861_v25 = vor.u32 %v935_v22, %v860_v20  ;;  %v788_v28 = vld [vmem:[#allocation5 + $0x150] sm:$0xf]  ;;  %451 = vmatpush.bf16.msra.mxu0 %v669_v16  ;;  %v917_v30 = vld [vmem:[#allocation5 + $0x154] sm:$0xf0]  ;;  %v725_v33 = vor.u32 %v901_v27, %v724_v26  ;;  %v652_v35 = vld [vmem:[#allocation5 + $0x40] sm:$0xf] }
  0x13   :  { %v852_v31 = vld [vmem:[#allocation5 + $0x1d0] sm:$0xf]  ;;  %v933_v32 = vld [vmem:[#allocation5 + $0x1d4] sm:$0xf0]  ;;  %464 = vmatpush.bf16.msra.mxu1 %v733_v17  ;;  %v789_v34 = vor.u32 %v917_v30, %v788_v28  ;;  %v883_v36 = vld [vmem:[#allocation5 + $0x44] sm:$0xf0] }
  0x14   :  { %477 = vmatpush.bf16.msra.mxu2 %v797_v21  ;;  %v716_v37 = vld [vmem:[#allocation5 + $0xc0] sm:$0xf]  ;;  %v853_v38 = vor.u32 %v933_v32, %v852_v31  ;;  %v899_v39 = vld [vmem:[#allocation5 + $0xc4] sm:$0xf0]  ;;  %v653_v44 = vor.u32 %v883_v36, %v652_v35  ;;  %v644_v47 = vld [vmem:[#allocation5 + $0x30] sm:$0xf] }
  0x15   :  { %490 = vmatpush.bf16.msra.mxu3 %v861_v25  ;;  %v780_v40 = vld [vmem:[#allocation5 + $0x140] sm:$0xf]  ;;  %v915_v41 = vld [vmem:[#allocation5 + $0x144] sm:$0xf0]  ;;  %v717_v45 = vor.u32 %v899_v39, %v716_v37  ;;  %v881_v48 = vld [vmem:[#allocation5 + $0x34] sm:$0xf0] }
  0x16   :  { %v844_v42 = vld [vmem:[#allocation5 + $0x1c0] sm:$0xf]  ;;  %v931_v43 = vld [vmem:[#allocation5 + $0x1c4] sm:$0xf0]  ;;  %452 = vmatpush.bf16.msra.mxu0 %v661_v29  ;;  %v781_v46 = vor.u32 %v915_v41, %v780_v40  ;;  %v708_v49 = vld [vmem:[#allocation5 + $0xb0] sm:$0xf]  ;;  %v645_v56 = vor.u32 %v881_v48, %v644_v47 }
  0x17   :  { %465 = vmatpush.bf16.msra.mxu1 %v725_v33  ;;  %v845_v50 = vor.u32 %v931_v43, %v844_v42  ;;  %v897_v51 = vld [vmem:[#allocation5 + $0xb4] sm:$0xf0]  ;;  %v772_v52 = vld [vmem:[#allocation5 + $0x130] sm:$0xf]  ;;  %v636_v59 = vld [vmem:[#allocation5 + $0x20] sm:$0xf] }
  0x18   :  { %478 = vmatpush.bf16.msra.mxu2 %v789_v34  ;;  %v913_v53 = vld [vmem:[#allocation5 + $0x134] sm:$0xf0]  ;;  %v836_v54 = vld [vmem:[#allocation5 + $0x1b0] sm:$0xf]  ;;  %v709_v57 = vor.u32 %v897_v51, %v708_v49  ;;  %v879_v60 = vld [vmem:[#allocation5 + $0x24] sm:$0xf0] }
  0x19   :  { %491 = vmatpush.bf16.msra.mxu3 %v853_v38  ;;  %v929_v55 = vld [vmem:[#allocation5 + $0x1b4] sm:$0xf0]  ;;  %v773_v58 = vor.u32 %v913_v53, %v772_v52  ;;  %v700_v61 = vld [vmem:[#allocation5 + $0xa0] sm:$0xf]  ;;  %v895_v63 = vld [vmem:[#allocation5 + $0xa4] sm:$0xf0]  ;;  %v637_v4 = vor.u32 %v879_v60, %v636_v59 }
  0x1a   :  { %453 = vmatpush.bf16.msra.mxu0 %v653_v44  ;;  %v837_v62 = vor.u32 %v929_v55, %v836_v54  ;;  %v764_v0 = vld [vmem:[#allocation5 + $0x120] sm:$0xf]  ;;  %v911_v1 = vld [vmem:[#allocation5 + $0x124] sm:$0xf0]  ;;  %v701_v5 = vor.u32 %v895_v63, %v700_v61  ;;  %v628_v7 = vld [vmem:[#allocation5 + $0x10] sm:$0xf] }
  0x1b   :  { %466 = vmatpush.bf16.msra.mxu1 %v717_v45  ;;  %v828_v2 = vld [vmem:[#allocation5 + $0x1a0] sm:$0xf]  ;;  %v927_v3 = vld [vmem:[#allocation5 + $0x1a4] sm:$0xf0]  ;;  %v765_v6 = vor.u32 %v911_v1, %v764_v0  ;;  %v877_v8 = vld [vmem:[#allocation5 + $0x14] sm:$0xf0] }
  0x1c   :  { %479 = vmatpush.bf16.msra.mxu2 %v781_v46  ;;  %v692_v9 = vld [vmem:[#allocation5 + $0x90] sm:$0xf]  ;;  %v829_v10 = vor.u32 %v927_v3, %v828_v2  ;;  %v893_v11 = vld [vmem:[#allocation5 + $0x94] sm:$0xf0]  ;;  %v629_v16 = vor.u32 %v877_v8, %v628_v7  ;;  %v620_v17 = vld [vmem:[#allocation5] sm:$0xf] }
  0x1d   :  { %492 = vmatpush.bf16.msra.mxu3 %v845_v50  ;;  %v756_v12 = vld [vmem:[#allocation5 + $0x110] sm:$0xf]  ;;  %v909_v13 = vld [vmem:[#allocation5 + $0x114] sm:$0xf0]  ;;  %v875_v18 = vld [vmem:[#allocation5 + $0x4] sm:$0xf0]  ;;  %v693_v19 = vor.u32 %v893_v11, %v692_v9 }
  0x1e   :  { %454 = vmatpush.bf16.msra.mxu0 %v645_v56  ;;  %v820_v14 = vld [vmem:[#allocation5 + $0x190] sm:$0xf]  ;;  %v925_v15 = vld [vmem:[#allocation5 + $0x194] sm:$0xf0]  ;;  %v757_v20 = vor.u32 %v909_v13, %v756_v12  ;;  %v684_v21 = vld [vmem:[#allocation5 + $0x80] sm:$0xf]  ;;  %v621_v31 = vor.u32 %v875_v18, %v620_v17 }
  0x1f   :  { %467 = vmatpush.bf16.msra.mxu1 %v709_v57  ;;  %v891_v22 = vld [vmem:[#allocation5 + $0x84] sm:$0xf0]  ;;  %v748_v23 = vld [vmem:[#allocation5 + $0x100] sm:$0xf]  ;;  %v821_v24 = vor.u32 %v925_v15, %v820_v14  ;;  %v888_v28 = vld [vmem:[#allocation5 + $0x74] sm:$0xf] }
  0x20   :  { %480 = vmatpush.bf16.msra.mxu2 %v773_v58  ;;  %v907_v25 = vld [vmem:[#allocation5 + $0x104] sm:$0xf0]  ;;  %v812_v26 = vld [vmem:[#allocation5 + $0x180] sm:$0xf]  ;;  %v678_v29 = vld [vmem:[#allocation5 + $0x78] sm:$0xf0]  ;;  %v685_v35 = vor.u32 %v891_v22, %v684_v21 }
  0x21   :  { %493 = vmatpush.bf16.msra.mxu3 %v837_v62  ;;  %v923_v27 = vld [vmem:[#allocation5 + $0x184] sm:$0xf0]  ;;  %v904_v30 = vld [vmem:[#allocation5 + $0xf4] sm:$0xf]  ;;  %v742_v32 = vld [vmem:[#allocation5 + $0xf8] sm:$0xf0]  ;;  %v749_v36 = vor.u32 %v907_v25, %v748_v23  ;;  %v681_v41 = vor.u32 %v888_v28, %v678_v29 }
  0x22   :  { %455 = vmatpush.bf16.msra.mxu0 %v637_v4  ;;  %v920_v33 = vld [vmem:[#allocation5 + $0x174] sm:$0xf]  ;;  %v806_v34 = vld [vmem:[#allocation5 + $0x178] sm:$0xf0]  ;;  %v813_v40 = vor.u32 %v923_v27, %v812_v26  ;;  %v886_v42 = vld [vmem:[#allocation5 + $0x64] sm:$0xf]  ;;  %v745_v45 = vor.u32 %v904_v30, %v742_v32 }
  0x23   :  { %468 = vmatpush.bf16.msra.mxu1 %v701_v5  ;;  %v936_v37 = vld [vmem:[#allocation5 + $0x1f4] sm:$0xf]  ;;  %v870_v38 = vld [vmem:[#allocation5 + $0x1f8] sm:$0xf0]  ;;  %v670_v43 = vld [vmem:[#allocation5 + $0x68] sm:$0xf0]  ;;  %v809_v46 = vor.u32 %v920_v33, %v806_v34 }
  0x24   :  { %481 = vmatpush.bf16.msra.mxu2 %v765_v6  ;;  %v54_v39 = vld [vmem:[#allocation2 + $0x10] sm:$0xff]  ;;  %v52_v44 = vld [vmem:[#allocation2] sm:$0xff]  ;;  %v55_v48 = vld [vmem:[#allocation2 + $0x18] sm:$0xff]  ;;  %v873_v50 = vor.u32 %v936_v37, %v870_v38  ;;  %v673_v59 = vor.u32 %v886_v42, %v670_v43  ;;  %s607_s10 = sshll.u32 %s1098_s5, 4  ;;  %vm598_vm0 = vcmask 64512   ;;  %s608_s10 = int_to_ptr.hbm [resolvable:$true] %s607_s10 }
  0x25   :  { %494 = vmatpush.bf16.msra.mxu3 %v829_v10  ;;  %v902_v47 = vld [vmem:[#allocation5 + $0xe4] sm:$0xf]  ;;  %v53_v49 = vld [vmem:[#allocation2 + $0x8] sm:$0xff]  ;;  %v1065_v54 = vpack.c.bf16 %v54_v39, %v54_v39  ;;  %v1067_v57 = vpack.c.bf16 %v52_v44, %v52_v44  ;;  %v1069_v58 = vpack.c.bf16 %v55_v48, %v55_v48  ;;  %v884_v63 = vld [vmem:[#allocation5 + $0x54] sm:$0xf] }
  0x26   :  { %456 = vmatpush.bf16.msra.mxu0 %v629_v16  ;;  %v734_v51 = vld [vmem:[#allocation5 + $0xe8] sm:$0xf0]  ;;  %v918_v52 = vld [vmem:[#allocation5 + $0x164] sm:$0xf]  ;;  %v1071_v60 = vpack.c.bf16 %v53_v49, %v53_v49  ;;  %v662_v0 = vld [vmem:[#allocation5 + $0x58] sm:$0xf0] }
  0x27   :  { %469 = vmatpush.bf16.msra.mxu1 %v693_v19  ;;  %v798_v53 = vld [vmem:[#allocation5 + $0x168] sm:$0xf0]  ;;  %v934_v55 = vld [vmem:[#allocation5 + $0x1e4] sm:$0xf]  ;;  %v737_v61 = vor.u32 %v902_v47, %v734_v51  ;;  %v900_v1 = vld [vmem:[#allocation5 + $0xd4] sm:$0xf]  ;;  %v665_v8 = vor.u32 %v884_v63, %v662_v0 }
  0x28   :  { %482 = vmatpush.bf16.msra.mxu2 %v757_v20  ;;  %v862_v56 = vld [vmem:[#allocation5 + $0x1e8] sm:$0xf0]  ;;  %v801_v62 = vor.u32 %v918_v52, %v798_v53  ;;  %v726_v3 = vld [vmem:[#allocation5 + $0xd8] sm:$0xf0]  ;;  %v916_v4 = vld [vmem:[#allocation5 + $0x154] sm:$0xf] }
  0x29   :  { %495 = vmatpush.bf16.msra.mxu3 %v821_v24  ;;  %v865_v2 = vor.u32 %v934_v55, %v862_v56  ;;  %v790_v5 = vld [vmem:[#allocation5 + $0x158] sm:$0xf0]  ;;  %v932_v6 = vld [vmem:[#allocation5 + $0x1d4] sm:$0xf]  ;;  %v729_v9 = vor.u32 %v900_v1, %v726_v3  ;;  %v882_v11 = vld [vmem:[#allocation5 + $0x44] sm:$0xf] }
  0x2a   :  { %457 = vmatpush.bf16.msra.mxu0 %v621_v31  ;;  %v854_v7 = vld [vmem:[#allocation5 + $0x1d8] sm:$0xf0]  ;;  %v793_v10 = vor.u32 %v916_v4, %v790_v5  ;;  %v654_v12 = vld [vmem:[#allocation5 + $0x48] sm:$0xf0]  ;;  %v898_v13 = vld [vmem:[#allocation5 + $0xc4] sm:$0xf] }
  0x2b   :  { %470 = vmatpush.bf16.msra.mxu1 %v685_v35  ;;  %v857_v14 = vor.u32 %v932_v6, %v854_v7  ;;  %v718_v15 = vld [vmem:[#allocation5 + $0xc8] sm:$0xf0]  ;;  %v914_v16 = vld [vmem:[#allocation5 + $0x144] sm:$0xf]  ;;  %v657_v20 = vor.u32 %v882_v11, %v654_v12  ;;  %v880_v23 = vld [vmem:[#allocation5 + $0x34] sm:$0xf] }
  0x2c   :  { %483 = vmatpush.bf16.msra.mxu2 %v749_v36  ;;  %v782_v17 = vld [vmem:[#allocation5 + $0x148] sm:$0xf0]  ;;  %v930_v18 = vld [vmem:[#allocation5 + $0x1c4] sm:$0xf]  ;;  %v721_v21 = vor.u32 %v898_v13, %v718_v15  ;;  %v646_v24 = vld [vmem:[#allocation5 + $0x38] sm:$0xf0] }
  0x2d   :  { %496 = vmatpush.bf16.msra.mxu3 %v813_v40  ;;  %458 = vmatmul.bf16.vlgmr.msra.gmra.mxu0 %v1067_v57  ;;  %v846_v19 = vld [vmem:[#allocation5 + $0x1c8] sm:$0xf0]  ;;  %v785_v22 = vor.u32 %v914_v16, %v782_v17  ;;  %v896_v25 = vld [vmem:[#allocation5 + $0xb4] sm:$0xf]  ;;  %v710_v27 = vld [vmem:[#allocation5 + $0xb8] sm:$0xf0]  ;;  %v649_v32 = vor.u32 %v880_v23, %v646_v24 }
  0x2e   :  { %502 = vmatpush.bf16.msrb.mxu0 %v681_v41  ;;  %471 = vmatmul.bf16.vlgmr.msra.gmra.mxu1 %v1071_v60  ;;  %v849_v26 = vor.u32 %v930_v18, %v846_v19  ;;  %v912_v28 = vld [vmem:[#allocation5 + $0x134] sm:$0xf]  ;;  %v774_v29 = vld [vmem:[#allocation5 + $0x138] sm:$0xf0]  ;;  %v713_v33 = vor.u32 %v896_v25, %v710_v27  ;;  %v878_v35 = vld [vmem:[#allocation5 + $0x24] sm:$0xf] }
  0x2f   :  { %515 = vmatpush.bf16.msrb.mxu1 %v745_v45  ;;  %484 = vmatmul.bf16.vlgmr.msra.gmra.mxu2 %v1065_v54  ;;  %v928_v30 = vld [vmem:[#allocation5 + $0x1b4] sm:$0xf]  ;;  %v838_v31 = vld [vmem:[#allocation5 + $0x1b8] sm:$0xf0]  ;;  %v777_v34 = vor.u32 %v912_v28, %v774_v29  ;;  %v638_v36 = vld [vmem:[#allocation5 + $0x28] sm:$0xf0] }
  0x30   :  { %528 = vmatpush.bf16.msrb.mxu2 %v809_v46  ;;  %497 = vmatmul.bf16.vlgmr.msra.gmra.mxu3 %v1069_v58  ;;  %v894_v37 = vld [vmem:[#allocation5 + $0xa4] sm:$0xf]  ;;  %v841_v38 = vor.u32 %v928_v30, %v838_v31  ;;  %v702_v39 = vld [vmem:[#allocation5 + $0xa8] sm:$0xf0]  ;;  %v641_v44 = vor.u32 %v878_v35, %v638_v36  ;;  %v876_v47 = vld [vmem:[#allocation5 + $0x14] sm:$0xf] }
  0x31   :  { %541 = vmatpush.bf16.msrb.mxu3 %v873_v50  ;;  %v910_v40 = vld [vmem:[#allocation5 + $0x124] sm:$0xf]  ;;  %v766_v41 = vld [vmem:[#allocation5 + $0x128] sm:$0xf0]  ;;  %v705_v45 = vor.u32 %v894_v37, %v702_v39  ;;  %v630_v48 = vld [vmem:[#allocation5 + $0x18] sm:$0xf0] }
  0x32   :  { %503 = vmatpush.bf16.msrb.mxu0 %v673_v59  ;;  %v926_v42 = vld [vmem:[#allocation5 + $0x1a4] sm:$0xf]  ;;  %v830_v43 = vld [vmem:[#allocation5 + $0x1a8] sm:$0xf0]  ;;  %v769_v46 = vor.u32 %v910_v40, %v766_v41  ;;  %v892_v49 = vld [vmem:[#allocation5 + $0x94] sm:$0xf]  ;;  %v633_v59 = vor.u32 %v876_v47, %v630_v48 }
  0x33   :  { %516 = vmatpush.bf16.msrb.mxu1 %v737_v61  ;;  %v833_v50 = vor.u32 %v926_v42, %v830_v43  ;;  %v694_v51 = vld [vmem:[#allocation5 + $0x98] sm:$0xf0]  ;;  %v908_v52 = vld [vmem:[#allocation5 + $0x114] sm:$0xf]  ;;  %v874_v63 = vld [vmem:[#allocation5 + $0x4] sm:$0xf] }
  0x34   :  { %529 = vmatpush.bf16.msrb.mxu2 %v801_v62  ;;  %v758_v53 = vld [vmem:[#allocation5 + $0x118] sm:$0xf0]  ;;  %v924_v55 = vld [vmem:[#allocation5 + $0x194] sm:$0xf]  ;;  %v697_v61 = vor.u32 %v892_v49, %v694_v51  ;;  %v622_v0 = vld [vmem:[#allocation5 + $0x8] sm:$0xf0] }
  0x35   :  { %542 = vmatpush.bf16.msrb.mxu3 %v865_v2  ;;  %v822_v56 = vld [vmem:[#allocation5 + $0x198] sm:$0xf0]  ;;  %v761_v62 = vor.u32 %v908_v52, %v758_v53  ;;  %v890_v1 = vld [vmem:[#allocation5 + $0x84] sm:$0xf]  ;;  %v686_v3 = vld [vmem:[#allocation5 + $0x88] sm:$0xf0] }
  0x36   :  { %504 = vmatpush.bf16.msrb.mxu0 %v665_v8  ;;  %v825_v2 = vor.u32 %v924_v55, %v822_v56  ;;  %v906_v4 = vld [vmem:[#allocation5 + $0x104] sm:$0xf]  ;;  %v750_v5 = vld [vmem:[#allocation5 + $0x108] sm:$0xf0]  ;;  %v625_v8 = vor.u32 %v874_v63, %v622_v0  ;;  %v124_v12 = vld [vmem:[%s1095_s2] sm:$0x3] }
  0x37   :  { %517 = vmatpush.bf16.msrb.mxu1 %v729_v9  ;;  %v922_v6 = vld [vmem:[#allocation5 + $0x184] sm:$0xf]  ;;  %v814_v7 = vld [vmem:[#allocation5 + $0x188] sm:$0xf0]  ;;  %v689_v9 = vor.u32 %v890_v1, %v686_v3  ;;  %v126_v13 = vperm.slane %v124_v12, 0  ;;  %v1027_v28 = vmov 0  }
  0x38   :  { %530 = vmatpush.bf16.msrb.mxu2 %v793_v10  ;;  %v753_v10 = vor.u32 %v906_v4, %v750_v5  ;;  %v817_v11 = vor.u32 %v922_v6, %v814_v7  ;;  %v559_v27 = vld [vmem:[%s1097_s4] sm:$0xff]  ;;  %944 = vset.pattern.permute.xlu0 %v1027_v28  ;;  %v127_v29 = vperm.slane %v124_v12, 1 }
  0x39   :  { %543 = vmatpush.bf16.msrb.mxu3 %v857_v14  ;;  %562 = vperm.xlu0 %944, %v559_v27  }
  0x3a   :  { %505 = vmatpush.bf16.msrb.mxu0 %v657_v20 }
  0x3b   :  { %518 = vmatpush.bf16.msrb.mxu1 %v721_v21 }
  0x3c   :  { %531 = vmatpush.bf16.msrb.mxu2 %v785_v22 }
  0x3d   :  { %544 = vmatpush.bf16.msrb.mxu3 %v849_v26 }
  0x3e   :  { %506 = vmatpush.bf16.msrb.mxu0 %v649_v32 }
  0x3f   :  { %519 = vmatpush.bf16.msrb.mxu1 %v713_v33 }
  0x40   :  { %532 = vmatpush.bf16.msrb.mxu2 %v777_v34 }
  0x41   :  { %545 = vmatpush.bf16.msrb.mxu3 %v841_v38 }
  0x42   :  { %507 = vmatpush.bf16.msrb.mxu0 %v641_v44 }
  0x43   :  { %520 = vmatpush.bf16.msrb.mxu1 %v705_v45 }
  0x44   :  { %533 = vmatpush.bf16.msrb.mxu2 %v769_v46 }
  0x45   :  { %546 = vmatpush.bf16.msrb.mxu3 %v833_v50 }
  0x46   :  { %508 = vmatpush.bf16.msrb.mxu0 %v633_v59 }
  0x47   :  { %521 = vmatpush.bf16.msrb.mxu1 %v697_v61 }
  0x48   :  { %534 = vmatpush.bf16.msrb.mxu2 %v761_v62 }
  0x49   :  { %547 = vmatpush.bf16.msrb.mxu3 %v825_v2 }
  0x4a   :  { %509 = vmatpush.bf16.msrb.mxu0 %v625_v8 }
  0x4b   :  { %522 = vmatpush.bf16.msrb.mxu1 %v689_v9 }
  0x4c   :  { %535 = vmatpush.bf16.msrb.mxu2 %v753_v10 }
  0x4d   :  { %548 = vmatpush.bf16.msrb.mxu3 %v817_v11  ;;  %510 = vmatmul.bf16.vlgmr.msrb.gmra.mxu0 %v1067_v57 }
  0x4e   :  { %523 = vmatmul.bf16.vlgmr.msrb.gmra.mxu1 %v1071_v60 }
  0x4f   :  { %536 = vmatmul.bf16.vlgmr.msrb.gmra.mxu2 %v1065_v54  ;;  %v556_v54 = vld [vmem:[%s1096_s3] sm:$0xff]  ;;  %s1028_s3 = smov [#allocation7]  }
  0x50   :  { %549 = vmatmul.bf16.vlgmr.msrb.gmra.mxu3 %v1069_v58  ;;  %v566_v24 = vunpack.c.l.b16 %v556_v54  ;;  %v567_v43 = vunpack.c.h.b16 %v556_v54  ;;  %s605_s4 = sshll.u32 %s1028_s3, 4  ;;  %s606_s4 = int_to_ptr.vmem [resolvable:$true] %s605_s4 }
  0x52   :  { %v568_v26 = vpack.c.b16 %v566_v24, %v566_v24  ;;  %v569_v45 = vpack.c.b16 %v567_v43, %v567_v43 }
  0xaa   :  { %v459_v14 = vpop.f32.mrf.mxu0 }
  0xab   :  { %v460_v15 = vadd.f32 %v459_v14, %v126_v13  ;;  %v472_v16 = vpop.f32.mrf.mxu1  ;;  %v563_v48 = vpop.permute.xlu0 %562 }
  0xad   :  { %v473_v17 = vadd.f32 %v472_v16, %v460_v15 }
  0xb2   :  { %v485_v18 = vpop.f32.mrf.mxu2  ;;  %v461_v57 = vpop.f32.mrf.mxu0 }
  0xb3   :  { %v486_v19 = vadd.f32 %v485_v18, %v473_v17  ;;  %v498_v20 = vpop.f32.mrf.mxu3  ;;  %v474_v22 = vpop.f32.mrf.mxu1 }
  0xb5   :  { %v499_v21 = vadd.f32 %v498_v20, %v486_v19 }
  0xb7   :  { %v554_v60 = vmax.f32 %v499_v21, 0.0 }
  0xb9   :  { %v557_v58 = vpack.c.bf16 %v554_v60, %v554_v60 }
  0xba   :  { %v487_v23 = vpop.f32.mrf.mxu2 }
  0xbb   :  { %v500_v25 = vpop.f32.mrf.mxu3  ;;  %579 = vmatpush.bf16.xpose.msra.mxu0 %v557_v58 }
  0xc2   :  { %580 = vmatmul.bf16.vlgmr.msra.gmra.mxu0 %v568_v26 }
  0xca   :  { %v511_v30 = vpop.f32.mrf.mxu0 }
  0xcb   :  { %v512_v31 = vadd.f32 %v511_v30, %v127_v29  ;;  %v524_v32 = vpop.f32.mrf.mxu1 }
  0xcd   :  { %v525_v33 = vadd.f32 %v524_v32, %v512_v31 }
  0xd2   :  { %v537_v34 = vpop.f32.mrf.mxu2  ;;  %v513_v37 = vpop.f32.mrf.mxu0 }
  0xd3   :  { %v538_v35 = vadd.f32 %v537_v34, %v525_v33  ;;  %v550_v36 = vpop.f32.mrf.mxu3  ;;  %v526_v38 = vpop.f32.mrf.mxu1 }
  0xd5   :  { %v551_v39 = vadd.f32 %v550_v36, %v538_v35 }
  0xd7   :  { %v555_v40 = vmax.f32 %v551_v39, 0.0 }
  0xd9   :  { %v558_v41 = vpack.c.bf16 %v555_v40, %v555_v40 }
  0xda   :  { %v539_v42 = vpop.f32.mrf.mxu2 }
  0xdb   :  { %v552_v44 = vpop.f32.mrf.mxu3  ;;  %592 = vmatpush.bf16.xpose.msra.mxu1 %v558_v41 }
  0xe2   :  { %593 = vmatmul.bf16.vlgmr.msra.gmra.mxu1 %v569_v45 }
 0x13f   :  { %v581_v46 = vpop.f32.mrf.mxu0 }
 0x140   :  { %v582_v49 = vadd.f32 %v581_v46, %v563_v48 }
 0x147   :  { %v583_v47 = vpop.f32.mrf.mxu0 }
 0x15f   :  { %v594_v50 = vpop.f32.mrf.mxu1 }
 0x160   :  { %v595_v51 = vadd.f32 %v594_v50, %v582_v49 }
 0x162   :  { %599 = vst.msk [vmem:[#allocation7] sm:$0xff] %vm598_vm0, %v595_v51 }
 0x163   :  { %610 = dma.vmem_to_hbm [thread:$0]  %s606_s4, 128, %s608_s10, [#allocation4]  }
 0x167   :  { %v596_v52 = vpop.f32.mrf.mxu1 }
 0x168   :  { %1021 = dma.done.wait [#allocation4], 128  }
 0x169   :  { %1022 = vsyncadd [#allocation4], 4294967168 }
 0x16a   :  { %615 = vsyncpa [#allocation3], 1 }
 0x16b   :  { %616 = vsyncpa [#allocation6], 1 }
 0x16c   :  { %617 = vsyncpa [#allocation4], 1 }

</bundles_post_ra>
